<compile_context>
chip_gen: v7x
topology: tpu7x:2x2x1
jax: 0.10.0
libtpu: 0.0.40
codegen_flags: <defaults>
</compile_context>

<pallas_src>
import functools

import jax
import jax.numpy as jnp
from jax.experimental import pallas as pl
from jax.experimental.pallas import tpu as pltpu

INPUT_SIZE = 256
HIDDEN_SIZE = 128
HIDDEN2_SIZE = HIDDEN_SIZE // 2   # 64, padded to 128 lanes inside the kernel
OUTPUT_SIZE = 10                  # padded to 128 lanes inside the kernel
PAD = 128
NEG_SLOPE = 0.01                  # nn.LeakyReLU default
BN_EPS = 1e-5


def _leaky_relu(x):
    return jnp.where(x > 0, x, NEG_SLOPE * x)


def _round_up(n, m):
    return ((n + m - 1) // m) * m


def _head_kernel(x_ref, w1_ref, w2_ref, w3_ref, t_ref, o_ref):
    """Fused 3-layer MLP head for one batch tile.

    Weights carry the folded BatchNorm scales; t_ref rows are [t1; t2; b3]
    (folded per-feature shifts and output bias). x arrives f32 and is cast to
    bf16 on the VPU (free — kernel is HBM-bound); matmuls accumulate in f32
    and the BN/LeakyReLU epilogue stays f32. Output is stored bf16.
    """
    x = x_ref[...].astype(jnp.bfloat16)                              # (bt, 256)

    # layer1 (+ folded bn1 scale) + shift + LeakyReLU; dropout1 == identity (eval)
    h1 = jnp.dot(x, w1_ref[...], preferred_element_type=jnp.float32)
    h1 = _leaky_relu(h1 + t_ref[0:1, :])                             # (bt, 128) f32

    # layer2 (+ folded bn2 scale, padded 64->128 lanes) + shift + LeakyReLU
    h2 = jnp.dot(h1.astype(jnp.bfloat16), w2_ref[...],
                 preferred_element_type=jnp.float32)
    h2 = _leaky_relu(h2 + t_ref[1:2, :])                             # (bt, 128) f32

    # linear4 (output padded 10->128 lanes; sliced back in the wrapper)
    o = jnp.dot(h2.astype(jnp.bfloat16), w3_ref[...],
                preferred_element_type=jnp.float32) + t_ref[2:3, :]
    o_ref[...] = o.astype(o_ref.dtype)                               # bf16 store


def fold_params(params):
    """Fold eval-mode BatchNorm into the Linears, pad to 128 lanes, cast bf16.

    Run once per model (params are static per model); the returned arrays are
    reused by every classification_head call, so the ~20 tiny fold/pad ops
    never sit on the per-forward critical path.
    """
    (w1, b1, g1, beta1, rm1, rv1,
     w2, b2, g2, beta2, rm2, rv2,
     w3, b3) = params

    #   y = gamma*(x@W + b - mean)/sqrt(var+eps) + beta = x@(W*s) + t
    s1 = g1 / jnp.sqrt(rv1 + BN_EPS)
    t1 = (b1 - rm1) * s1 + beta1
    s2 = g2 / jnp.sqrt(rv2 + BN_EPS)
    t2 = (b2 - rm2) * s2 + beta2

    w1f = (w1 * s1[None, :]).astype(jnp.bfloat16)                     # (256, 128)
    w2f = jnp.zeros((HIDDEN_SIZE, PAD), jnp.float32)
    w2f = w2f.at[:, :HIDDEN2_SIZE].set(w2 * s2[None, :]).astype(jnp.bfloat16)
    w3f = jnp.zeros((PAD, PAD), jnp.float32)
    w3f = w3f.at[:HIDDEN2_SIZE, :OUTPUT_SIZE].set(w3).astype(jnp.bfloat16)

    # Pack the three per-feature shift rows into a single (3, 128) block.
    t = jnp.zeros((3, PAD), jnp.float32)
    t = t.at[0, :HIDDEN_SIZE].set(t1)
    t = t.at[1, :HIDDEN2_SIZE].set(t2)
    t = t.at[2, :OUTPUT_SIZE].set(b3)

    return (jax.device_put(w1f), jax.device_put(w2f),
            jax.device_put(w3f), jax.device_put(t))


@functools.partial(jax.jit, static_argnames=("batch_tile",))
def classification_head(x, folded, batch_tile=None):
    """x: (B, INPUT_SIZE) float32, folded = fold_params(params)
    -> (B, OUTPUT_SIZE) float32."""
    B, F = x.shape
    assert F == INPUT_SIZE
    w1f, w2f, w3f, t = folded

    if batch_tile is None:
        # Large tiles amortize the ~0.35us per-grid-step overhead; keep >= 2
        # grid steps when possible so both v7x TensorCores get work and input
        # prefetch / output writeback overlap compute. Working set is ~1-3 MiB
        # even at tile 1024, far under every generation's VMEM budget.
        batch_tile = max(8, min(1024, _round_up(pl.cdiv(B, 2), 8)))

    grid = (pl.cdiv(B, batch_tile),)   # partial last block: OOB writes masked
    full = lambda shape: pl.BlockSpec(shape, lambda i: (0, 0))

    flops = 2 * B * (INPUT_SIZE * HIDDEN_SIZE + HIDDEN_SIZE * PAD + PAD * PAD)
    bytes_accessed = (B * INPUT_SIZE * 4                                    # x (f32)
                      + (INPUT_SIZE * HIDDEN_SIZE + HIDDEN_SIZE * PAD + PAD * PAD) * 2
                      + 3 * PAD * 4                                         # shifts
                      + B * PAD * 2)                                        # out (bf16)

    out = pl.pallas_call(
        _head_kernel,
        out_shape=jax.ShapeDtypeStruct((B, PAD), jnp.bfloat16),
        grid_spec=pltpu.PrefetchScalarGridSpec(
            num_scalar_prefetch=0,
            grid=grid,
            in_specs=[
                pl.BlockSpec((batch_tile, INPUT_SIZE), lambda i: (i, 0)),  # x tile (f32)
                full((INPUT_SIZE, HIDDEN_SIZE)),                           # w1*s1
                full((HIDDEN_SIZE, PAD)),                                  # w2*s2 (padded)
                full((PAD, PAD)),                                          # w3 (padded)
                full((3, PAD)),                                            # [t1; t2; b3]
            ],
            out_specs=pl.BlockSpec((batch_tile, PAD), lambda i: (i, 0)),
        ),
        compiler_params=pltpu.CompilerParams(
            dimension_semantics=("parallel",)),
        cost_estimate=pl.CostEstimate(flops=flops, transcendentals=0,
                                      bytes_accessed=bytes_accessed),
    )(x, w1f, w2f, w3f, t)

    return out[:, :OUTPUT_SIZE].astype(jnp.float32)


def init_params(key):
    """Deterministic synthetic parameters matching the PyTorch module shapes."""
    ks = jax.random.split(key, 10)

    def linear(kw, kb, fan_in, fan_out):
        bound = 1.0 / (fan_in ** 0.5)
        w = jax.random.uniform(kw, (fan_in, fan_out), jnp.float32, -bound, bound)
        b = jax.random.uniform(kb, (fan_out,), jnp.float32, -bound, bound)
        return w, b

    w1, b1 = linear(ks[0], ks[1], INPUT_SIZE, HIDDEN_SIZE)
    w2, b2 = linear(ks[2], ks[3], HIDDEN_SIZE, HIDDEN2_SIZE)
    w3, b3 = linear(ks[4], ks[5], HIDDEN2_SIZE, OUTPUT_SIZE)

    # BatchNorm params: affine gamma/beta and running mean/var (non-trivial).
    g1 = 1.0 + 0.1 * jax.random.normal(ks[6], (HIDDEN_SIZE,), jnp.float32)
    beta1 = 0.1 * jax.random.normal(ks[7], (HIDDEN_SIZE,), jnp.float32)
    rm1 = 0.05 * jax.random.normal(ks[8], (HIDDEN_SIZE,), jnp.float32)
    rv1 = jnp.abs(1.0 + 0.1 * jax.random.normal(ks[9], (HIDDEN_SIZE,), jnp.float32))

    k2 = jax.random.split(ks[9], 4)
    g2 = 1.0 + 0.1 * jax.random.normal(k2[0], (HIDDEN2_SIZE,), jnp.float32)
    beta2 = 0.1 * jax.random.normal(k2[1], (HIDDEN2_SIZE,), jnp.float32)
    rm2 = 0.05 * jax.random.normal(k2[2], (HIDDEN2_SIZE,), jnp.float32)
    rv2 = jnp.abs(1.0 + 0.1 * jax.random.normal(k2[3], (HIDDEN2_SIZE,), jnp.float32))

    return (w1, b1, g1, beta1, rm1, rv1,
            w2, b2, g2, beta2, rm2, rv2,
            w3, b3)


def reference_forward(x, params):
    """Pure-jnp f32 reference (eval-mode BN, identity dropout)."""
    (w1, b1, g1, beta1, rm1, rv1,
     w2, b2, g2, beta2, rm2, rv2,
     w3, b3) = params
    h = x @ w1 + b1
    h = g1 * (h - rm1) / jnp.sqrt(rv1 + BN_EPS) + beta1
    h = jnp.where(h > 0, h, NEG_SLOPE * h)
    h = h @ w2 + b2
    h = g2 * (h - rm2) / jnp.sqrt(rv2 + BN_EPS) + beta2
    h = jnp.where(h > 0, h, NEG_SLOPE * h)
    return h @ w3 + b3


if __name__ == "__main__":
    key = jax.random.PRNGKey(0)
    k_x, k_p = jax.random.split(key)

    B = 16
    x = jax.random.normal(k_x, (B, INPUT_SIZE), jnp.float32)
    params = init_params(k_p)

    folded = fold_params(params)          # one-time per-model preprocessing
    out = classification_head(x, folded)
    out = jax.block_until_ready(out)

    ref = reference_forward(x, params)
    assert out.shape == (B, OUTPUT_SIZE)
    # Tolerance accounts for bf16 matmul operands and the bf16 output store
    # (accumulation and the BN/LeakyReLU epilogue stay f32).
    assert jnp.allclose(out, ref, atol=5e-2, rtol=5e-2), "mismatch vs reference"

    print("KERNEL_OK")
</pallas_src>

<mosaic_0001>
module attributes {stable_mosaic.version = 11 : i64} {
  func.func @_head_kernel(%arg0: i32, %arg1: memref<8x256xf32, #tpu.memory_space<vmem>>, %arg2: memref<256x128xbf16, #tpu.memory_space<vmem>>, %arg3: memref<128x128xbf16, #tpu.memory_space<vmem>>, %arg4: memref<128x128xbf16, #tpu.memory_space<vmem>>, %arg5: memref<3x128xf32, #tpu.memory_space<vmem>>, %arg6: memref<8x128xbf16, #tpu.memory_space<vmem>>) attributes {dimension_semantics = [#tpu.dimension_semantics<parallel>], iteration_bounds = array<i64: 2>, scalar_prefetch = 0 : i64, scratch_operands = 0 : i64, tpu.core_type = #tpu.core_type<tc>, window_params = [{transform_indices = @transform_0, window_bounds = array<i64: 8, 256>}, {pipeline_mode = #tpu.pipeline_mode<synchronous>, transform_indices = @transform_1, window_bounds = array<i64: 256, 128>}, {pipeline_mode = #tpu.pipeline_mode<synchronous>, transform_indices = @transform_2, window_bounds = array<i64: 128, 128>}, {pipeline_mode = #tpu.pipeline_mode<synchronous>, transform_indices = @transform_3, window_bounds = array<i64: 128, 128>}, {pipeline_mode = #tpu.pipeline_mode<synchronous>, transform_indices = @transform_4, window_bounds = array<i64: 3, 128>}, {transform_indices = @transform_5, window_bounds = array<i64: 8, 128>}]} {
    %c0 = arith.constant 0 : index
    %c0_0 = arith.constant 0 : index
    %0 = vector.load %arg1[%c0, %c0_0] : memref<8x256xf32, #tpu.memory_space<vmem>>, vector<8x256xf32>
    %1 = arith.truncf %0 : vector<8x256xf32> to vector<8x256xbf16>
    %c0_1 = arith.constant 0 : index
    %c0_2 = arith.constant 0 : index
    %2 = vector.load %arg2[%c0_1, %c0_2] : memref<256x128xbf16, #tpu.memory_space<vmem>>, vector<256x128xbf16>
    %cst = arith.constant dense<0.000000e+00> : vector<8x128xf32>
    %3 = tpu.matmul %1, %2, %cst {dimension_numbers = #tpu.dot_dimension_numbers<[1], [0], [0], [1], [0, 0, 1, 1], [], []>} : vector<8x256xbf16>, vector<256x128xbf16>, vector<8x128xf32> -> vector<8x128xf32>
    %c0_3 = arith.constant 0 : index
    %c0_4 = arith.constant 0 : index
    %4 = vector.load %arg5[%c0_3, %c0_4] : memref<3x128xf32, #tpu.memory_space<vmem>>, vector<1x128xf32>
    %5 = vector.broadcast %4 : vector<1x128xf32> to vector<8x128xf32>
    %6 = arith.addf %3, %5 : vector<8x128xf32>
    %cst_5 = arith.constant 0.000000e+00 : f32
    %7 = vector.broadcast %cst_5 : f32 to vector<8x128xf32>
    %8 = arith.cmpf ogt, %6, %7 : vector<8x128xf32>
    %cst_6 = arith.constant 0.00999999977 : f32
    %9 = vector.broadcast %cst_6 : f32 to vector<8x128xf32>
    %10 = arith.mulf %9, %6 : vector<8x128xf32>
    %11 = arith.select %8, %6, %10 : vector<8x128xi1>, vector<8x128xf32>
    %12 = arith.truncf %11 : vector<8x128xf32> to vector<8x128xbf16>
    %c0_7 = arith.constant 0 : index
    %c0_8 = arith.constant 0 : index
    %13 = vector.load %arg3[%c0_7, %c0_8] : memref<128x128xbf16, #tpu.memory_space<vmem>>, vector<128x128xbf16>
    %cst_9 = arith.constant dense<0.000000e+00> : vector<8x128xf32>
    %14 = tpu.matmul %12, %13, %cst_9 {dimension_numbers = #tpu.dot_dimension_numbers<[1], [0], [0], [1], [0, 0, 1, 1], [], []>} : vector<8x128xbf16>, vector<128x128xbf16>, vector<8x128xf32> -> vector<8x128xf32>
    %c1 = arith.constant 1 : index
    %c0_10 = arith.constant 0 : index
    %15 = vector.load %arg5[%c1, %c0_10] : memref<3x128xf32, #tpu.memory_space<vmem>>, vector<1x128xf32>
    %16 = vector.broadcast %15 : vector<1x128xf32> to vector<8x128xf32>
    %17 = arith.addf %14, %16 : vector<8x128xf32>
    %cst_11 = arith.constant 0.000000e+00 : f32
    %18 = vector.broadcast %cst_11 : f32 to vector<8x128xf32>
    %19 = arith.cmpf ogt, %17, %18 : vector<8x128xf32>
    %cst_12 = arith.constant 0.00999999977 : f32
    %20 = vector.broadcast %cst_12 : f32 to vector<8x128xf32>
    %21 = arith.mulf %20, %17 : vector<8x128xf32>
    %22 = arith.select %19, %17, %21 : vector<8x128xi1>, vector<8x128xf32>
    %23 = arith.truncf %22 : vector<8x128xf32> to vector<8x128xbf16>
    %c0_13 = arith.constant 0 : index
    %c0_14 = arith.constant 0 : index
    %24 = vector.load %arg4[%c0_13, %c0_14] : memref<128x128xbf16, #tpu.memory_space<vmem>>, vector<128x128xbf16>
    %cst_15 = arith.constant dense<0.000000e+00> : vector<8x128xf32>
    %25 = tpu.matmul %23, %24, %cst_15 {dimension_numbers = #tpu.dot_dimension_numbers<[1], [0], [0], [1], [0, 0, 1, 1], [], []>} : vector<8x128xbf16>, vector<128x128xbf16>, vector<8x128xf32> -> vector<8x128xf32>
    %c2 = arith.constant 2 : index
    %c0_16 = arith.constant 0 : index
    %26 = vector.load %arg5[%c2, %c0_16] : memref<3x128xf32, #tpu.memory_space<vmem>>, vector<1x128xf32>
    %27 = vector.broadcast %26 : vector<1x128xf32> to vector<8x128xf32>
    %28 = arith.addf %25, %27 : vector<8x128xf32>
    %29 = arith.truncf %28 : vector<8x128xf32> to vector<8x128xbf16>
    %c0_17 = arith.constant 0 : index
    %c0_18 = arith.constant 0 : index
    %30 = vector.load %arg6[%c0_17, %c0_18] : memref<8x128xbf16, #tpu.memory_space<vmem>>, vector<8x128xbf16>
    tpu.vector_store %arg6[%c0_17, %c0_18], %29 {strides = array<i32>} : memref<8x128xbf16, #tpu.memory_space<vmem>>, vector<8x128xbf16>,
    return
  }
  func.func @transform_0(%arg0: i32) -> (i32, i32) {
    %c0_i32 = arith.constant 0 : i32
    %c0_i32_0 = arith.constant 0 : i32
    return %arg0, %c0_i32 : i32, i32
  }
  func.func @transform_1(%arg0: i32) -> (i32, i32) {
    %c0_i32 = arith.constant 0 : i32
    %c0_i32_0 = arith.constant 0 : i32
    %c0_i32_1 = arith.constant 0 : i32
    return %c0_i32, %c0_i32_0 : i32, i32
  }
  func.func @transform_2(%arg0: i32) -> (i32, i32) {
    %c0_i32 = arith.constant 0 : i32
    %c0_i32_0 = arith.constant 0 : i32
    %c0_i32_1 = arith.constant 0 : i32
    return %c0_i32, %c0_i32_0 : i32, i32
  }
  func.func @transform_3(%arg0: i32) -> (i32, i32) {
    %c0_i32 = arith.constant 0 : i32
    %c0_i32_0 = arith.constant 0 : i32
    %c0_i32_1 = arith.constant 0 : i32
    return %c0_i32, %c0_i32_0 : i32, i32
  }
  func.func @transform_4(%arg0: i32) -> (i32, i32) {
    %c0_i32 = arith.constant 0 : i32
    %c0_i32_0 = arith.constant 0 : i32
    %c0_i32_1 = arith.constant 0 : i32
    return %c0_i32, %c0_i32_0 : i32, i32
  }
  func.func @transform_5(%arg0: i32) -> (i32, i32) {
    %c0_i32 = arith.constant 0 : i32
    %c0_i32_0 = arith.constant 0 : i32
    return %arg0, %c0_i32 : i32, i32
  }
}

</mosaic_0001>

<bundles_post_ra>
// kernel: classification_head.1
= control target key start
LH: loop header
LB: loop body
LE: loop exit
PB: predicated region body
PF: predicated region fallthrough
CT: control target
= control target key end

     0   :  { %10 = vsyncpa [#allocation3], 0  ;;  %s1467_s0 = inlined_call_operand.hbm [shape: f32[16,256], index: 0, kind: input, shape index: {}]   ;;  %s1468_s1 = inlined_call_operand.hbm [shape: bf16[256,128], index: 1, kind: input, shape index: {}]   ;;  %s1469_s2 = inlined_call_operand.hbm [shape: bf16[128,128], index: 2, kind: input, shape index: {}]   ;;  %s1470_s3 = inlined_call_operand.hbm [shape: bf16[128,128], index: 3, kind: input, shape index: {}]   ;;  %s1471_s4 = inlined_call_operand.vmem [shape: f32[3,128], index: 4, kind: input, shape index: {}]   ;;  %s1472_s5 = inlined_call_operand.vmem [shape: bf16[16,128], index: 5, kind: output, shape index: {}]  }
   0x1   :  { %12 = vsyncpa [#allocation3 + $0x1], 0 }
   0x2   :  { %13 = vsyncpa [#allocation5], 0 }
   0x3   :  { %14 = vsyncpa [#allocation8], 0  ;;  %s1220_s18 = smov 0   ;;  %s1222_s19 = smov 0  }
   0x4   :  { %s1224_s20 = smov 0   ;;  %s1226_s21 = smov 0  }
   0x5 LB: > { %s1239_s22 = sadd.s32 4294967295, %s1180_s21   ;;  %p40_p0 = scmp.ne.s32.totalorder %s1172_s19, %s1168_s18  ;;  %s1180_s21 = sphi %s1226_s21, %s1490_s21   ;;  %s1176_s20 = sphi %s1224_s20, %s1489_s20   ;;  %s1172_s19 = sphi %s1222_s19, %s1488_s19   ;;  %s1168_s18 = sphi %s1220_s18, %s1487_s18  }
   0x6   : > { %p1473_p1 = scmp.eq.s32.totalorder %s1239_s22, 0  ;;  %p786_p2 = scmp.ge.s32.totalorder %s1180_s21, 1 }
   0x7   : > { %p161_p3 = scmp.lt.s32.totalorder %s1180_s21, 3  ;;  %s1182_s25 = smov [#allocation4]  }
   0x8   : > { %p1247_p4 = por %p1473_p1, %p40_p0  ;;  %s173_s26 = sshll.u32 %s1182_s25, 4  ;;  %s1255_s26 = int_to_ptr.vmem [resolvable:$true] %s173_s26 }
   0x9   : > { %p1251_p5 = pnand %p786_p2, %p161_p3  ;;  %s1183_s28 = smov [#allocation6]  }
   0xa   : > { %s1476_s23 = scalar_select %p1247_p4, 1, 0 }
   0xb   : > { %s1477_s24 = scalar_select %p1251_p5, 1, 0 }
   0xc   : > { %p932_p6 = pneg %p1251_p5  ;;  %s186_s29 = sshll.u32 %s1183_s28, 4  ;;  %s1265_s29 = int_to_ptr.vmem [resolvable:$true] %s186_s29 }
   0xd   : > { %s1184_s30 = smov [#allocation7]   ;;  %s1024_s9 = scalar_lea.hbm %s1468_s1, 2048 }
   0xe   : > { %p1261_p7 = pnand %p932_p6, %p1473_p1  ;;  %s1267_s6 = sshll.u32 %s1184_s30, 4  ;;  %s200_s6 = int_to_ptr.vmem [resolvable:$true] %s1267_s6 }
   0xf   : > { %p1025_p8 = scmp.ne.s32.totalorder %s1468_s1, %s1024_s9  ;;  %p1031_p12 = scmp.lt.u32.totalorder %s1024_s9, %s1468_s1 }
  0x10   : > { %p1277_p9 = pneg %p1261_p7 }
  0x12   : > { %p1027_p10 = pnand %p1277_p9, %p1025_p8 }
  0x14   : > { %p1028_p11 = pneg %p1027_p10 }
  0x16   : > { %p1033_p13 = pnand %p1031_p12, %p1028_p11 }
  0x18   : > { %1036 = shalt.err (!%p1033_p13)
}
  0x19   : > { %s1037_s15 = scalar_lea.vmem %s1255_s26, 2048  ;;  %p1045_p6 = scmp.lt.s32.totalorder %s1255_s26, %s1255_s26 }
  0x1a   : > { %p1038_p0 = scmp.ne.s32.totalorder %s1255_s26, %s1037_s15  ;;  %p1046_p1 = scmp.lt.s32.totalorder %s1037_s15, %s1037_s15 }
  0x1c   : > { %p1040_p2 = pnand %p1038_p0, %p1277_p9  ;;  %p1047_p8 = por %p1046_p1, %p1045_p6 }
  0x1e   : > { %p1041_p3 = pneg %p1040_p2 }
  0x20   : > { %p1048_p10 = pnand %p1047_p8, %p1041_p3 }
  0x22   : > { %1051 = shalt.err (!%p1048_p10)
}
  0x23   : > { %s1185_s16 = smov 64   ;;  %s1186_s17 = smov 4  }
  0x24   : > { %935 = dma.hbm_to_vmem [thread:$0]  (!%p1261_p7), %s1468_s1, 2048, %s1255_s26, [#allocation5], %s1185_s16, %s1185_s16, %s1186_s17  }
  0x25   : > { %s1052_s7 = scalar_lea.hbm %s1469_s2, 1024 }
  0x26   : > { %p1053_p1 = scmp.ne.s32.totalorder %s1469_s2, %s1052_s7  ;;  %p1059_p13 = scmp.lt.u32.totalorder %s1052_s7, %s1469_s2 }
  0x28   : > { %p1055_p11 = pnand %p1053_p1, %p1277_p9 }
  0x2a   : > { %p1056_p12 = pneg %p1055_p11 }
  0x2c   : > { %p1061_p0 = pnand %p1059_p13, %p1056_p12 }
  0x2e   : > { %1064 = shalt.err (!%p1061_p0)
}
  0x2f   : > { %s1065_s26 = scalar_lea.vmem %s1265_s29, 1024  ;;  %p1073_p8 = scmp.lt.s32.totalorder %s1265_s29, %s1265_s29 }
  0x30   : > { %p1066_p2 = scmp.ne.s32.totalorder %s1265_s29, %s1065_s26  ;;  %p1074_p10 = scmp.lt.s32.totalorder %s1065_s26, %s1065_s26 }
  0x32   : > { %p1068_p3 = pnand %p1066_p2, %p1277_p9  ;;  %p1075_p1 = por %p1074_p10, %p1073_p8 }
  0x34   : > { %p1069_p6 = pneg %p1068_p3 }
  0x36   : > { %p1076_p11 = pnand %p1075_p1, %p1069_p6 }
  0x38   : > { %1079 = shalt.err (!%p1076_p11)
}
  0x39   : > { %938 = dma.hbm_to_vmem [thread:$0]  (!%p1261_p7), %s1469_s2, 1024, %s1265_s29, [#allocation5], %s1185_s16, %s1185_s16, %s1186_s17  }
  0x3a   : > { %s1080_s25 = scalar_lea.hbm %s1470_s3, 1024 }
  0x3b   : > { %p1081_p12 = scmp.ne.s32.totalorder %s1470_s3, %s1080_s25  ;;  %p1087_p2 = scmp.lt.u32.totalorder %s1080_s25, %s1470_s3 }
  0x3d   : > { %p1083_p13 = pnand %p1081_p12, %p1277_p9 }
  0x3f   : > { %p1084_p0 = pneg %p1083_p13 }
  0x41   : > { %p1089_p3 = pnand %p1087_p2, %p1084_p0 }
  0x43   : > { %1092 = shalt.err (!%p1089_p3)
}
  0x44   : > { %s1093_s9 = scalar_lea.vmem %s200_s6, 1024  ;;  %p1101_p1 = scmp.lt.s32.totalorder %s200_s6, %s200_s6 }
  0x45   : > { %p1094_p6 = scmp.ne.s32.totalorder %s200_s6, %s1093_s9  ;;  %p1102_p11 = scmp.lt.s32.totalorder %s1093_s9, %s1093_s9 }
  0x47   : > { %p1096_p8 = pnand %p1094_p6, %p1277_p9  ;;  %p1103_p4 = por %p1102_p11, %p1101_p1 }
  0x49   : > { %p1097_p10 = pneg %p1096_p8 }
  0x4b   : > { %p1104_p5 = pnand %p1103_p4, %p1097_p10 }
  0x4d   : > { %1107 = shalt.err (!%p1104_p5)
}
  0x4e   : > { %941 = dma.hbm_to_vmem [thread:$0]  (!%p1261_p7), %s1470_s3, 1024, %s200_s6, [#allocation8], %s1185_s16, %s1185_s16, %s1186_s17  }
  0x4f   : > { %s1350_s12 = sadd.s32 1, %s1180_s21   ;;  %s27_s11 = sadd.s32 1, %s1176_s20 }
  0x50   : > { %s24_s27 = ssub.s32 %s1180_s21, %s1350_s12  ;;  %p34_p5 = scmp.ne.s32.totalorder %s1176_s20, %s1172_s19 }
  0x51   : > { %p25_p4 = scmp.eq.s32.totalorder %s24_s27, 0  ;;  %p35_p9 = scmp.eq.s32.totalorder %s1180_s21, 0 }
  0x52   : > { %p949_p12 = scmp.lt.s32.totalorder %s1180_s21, 2  ;;  %s216_s13 = sand.u32 1, %s1176_s20  }
  0x53   : > { %s1360_s26 = scalar_select %p25_p4, %s1176_s20, %s27_s11  }
  0x54   : > { %p36_p13 = por %p35_p9, %p34_p5  ;;  %s791_s14 = sshll.u32 %s216_s13, 4 }
  0x55   : > { %s837_s15 = sshll.u32 %s1180_s21, 8  ;;  %s220_s6 = scalar_lea.vmem [#allocation2], %s791_s14 }
  0x56   : > { %s1367_s28 = scalar_lea.hbm %s1467_s0, %s837_s15  ;;  %s228_s16 = sshll.u32 %s220_s6, 4  ;;  %s1369_s16 = int_to_ptr.vmem [resolvable:$true] %s228_s16 }
  0x57   : > { %p1371_p7 = pnand %p949_p12, %p36_p13  ;;  %s217_s21 = scalar_lea.sflag [#allocation3], %s216_s13 }
  0x58   : > { %s1108_s30 = scalar_lea.hbm %s1367_s28, 256  ;;  %s1113_s9 = scalar_lea.hbm %s1467_s0, 512 }
  0x59   : > { %p1109_p0 = scmp.ne.s32.totalorder %s1367_s28, %s1108_s30  ;;  %p1110_p2 = pneg %p1371_p7 }
  0x5a   : > { %p1114_p8 = scmp.lt.u32.totalorder %s1367_s28, %s1467_s0  ;;  %p1115_p10 = scmp.lt.u32.totalorder %s1113_s9, %s1108_s30 }
  0x5b   : > { %p1111_p3 = pnand %p1110_p2, %p1109_p0  ;;  %p1117_p11 = scmp.lt.u32.totalorder %s1108_s30, %s1367_s28 }
  0x5c   : > { %p1116_p1 = por %p1115_p10, %p1114_p8 }
  0x5d   : > { %p1112_p6 = pneg %p1111_p3 }
  0x5e   : > { %p1118_p4 = por %p1117_p11, %p1116_p1 }
  0x60   : > { %p1119_p5 = pnand %p1118_p4, %p1112_p6 }
  0x62   : > { %1122 = shalt.err (!%p1119_p5)
}
  0x63   : > { %s1123_s27 = scalar_lea.vmem %s1369_s16, 256  ;;  %s1187_s11 = smov [#allocation2]  }
  0x64   : > { %p1124_p9 = scmp.ne.s32.totalorder %s1369_s16, %s1123_s27  ;;  %s1128_s13 = sshll.u32 %s1187_s11, 4  ;;  %s1129_s13 = int_to_ptr.vmem [resolvable:$false] %s1128_s13 }
  0x65   : > { %s1130_s14 = scalar_lea.vmem %s1129_s13, 512  ;;  %p1131_p0 = scmp.lt.s32.totalorder %s1369_s16, %s1129_s13 }
  0x66   : > { %p1126_p12 = pnand %p1124_p9, %p1110_p2  ;;  %p1132_p3 = scmp.lt.s32.totalorder %s1130_s14, %s1123_s27 }
  0x68   : > { %p1127_p13 = pneg %p1126_p12  ;;  %p1133_p8 = por %p1132_p3, %p1131_p0 }
  0x6a   : > { %p1134_p10 = pnand %p1133_p8, %p1127_p13 }
  0x6c   : > { %1137 = shalt.err (!%p1134_p10)
}
  0x6d   : > { %945 = dma.hbm_to_vmem [thread:$0]  (!%p1371_p7), %s1367_s28, 256, %s1369_s16, %s217_s21  }
  0x6e   : > { %p1481_p6 = scmp.ne.s32.totalorder %s1477_s24, 0 }
  0x6f   : > { %s239_s15 = sand.u32 (!%p1481_p6), 1, %s1172_s19   ;;  %p1482_p2 = scmp.ne.s32.totalorder (!%p1481_p6), %s1476_s23, 0 }
  0x70   : > { %237 = sbr.rel (%p1481_p6) target bundleno = 817 (0x331), region = 40  ;;  %s1403_s18 = sshll.u32 (!%p1481_p6), %s239_s15, 4 }
  0x71   : > { %s240_s25 = scalar_lea.sflag (!%p1481_p6), [#allocation3], %s239_s15  ;;  %s243_s6 = scalar_lea.vmem (!%p1481_p6), [#allocation2], %s1403_s18 }
  0x77   : > { %1155 = dma.done.wait (%p1482_p2), %s240_s25, 256  }
  0x78   : > { %1157 = vsyncadd (%p1482_p2), %s240_s25, 4294967040  ;;  %p1483_p1 = scmp.eq.s32.totalorder %s1239_s22, 0 }
  0x7a   : > { %1159 = dma.done.wait (%p1483_p1), [#allocation5], 3072   ;;  %p1484_p7 = pmov %p1483_p1 }
  0x7b   : > { %p1485_p11 = pmov %p1483_p1 }
  0x7c   : > { %1161 = vsyncadd (%p1484_p7), [#allocation5], 4294964224 }
  0x7d   : > { %1163 = dma.done.wait (%p1485_p11), [#allocation8], 1024   ;;  %p1486_p4 = pmov %p1483_p1 }
  0x7e   : > { %v1188_v0 = vmov 0.0   ;;  %v992_v1 = vld [vmem:[#allocation4 + $0x40] sm:$0xff]   ;;  %v994_v3 = vld [vmem:[#allocation4 + $0x48] sm:$0xff]   ;;  %v996_v5 = vld [vmem:[#allocation4 + $0x50] sm:$0xff]   ;;  %vm1189_vm0 = vmmov 0   ;;  %p281_p5 = scmp.lt.s32.totalorder %s1239_s22, 1 }
  0x7f   : > { %1165 = vsyncadd (%p1486_p4), [#allocation8], 4294966272  ;;  %878 = vmatprep.subr.bf16.mxu1 %v1188_v0  ;;  %v993_v2 = vld [vmem:[#allocation4] sm:$0xff]   ;;  %838 = vmatprep.subr.bf16.mxu0 %v992_v1  ;;  %v995_v4 = vld [vmem:[#allocation4 + $0x8] sm:$0xff]  }
  0x80   : > { %839 = vmatpush3.bf16.msra.mxu0 %v993_v2  ;;  %v997_v6 = vld [vmem:[#allocation4 + $0x10] sm:$0xff]   ;;  %v998_v7 = vld [vmem:[#allocation4 + $0x58] sm:$0xff]   ;;  %v1000_v9 = vld [vmem:[#allocation4 + $0x60] sm:$0xff]   ;;  %894 = vmatprep.mubr.msk.bf16.mxu1 %vm1189_vm0, %v1188_v0  ;;  %s1492_s22 = smov (!%p281_p5, %s1239_s22), 1 }
  0x81   : > { %840 = vmatprep.subr.bf16.mxu0 %v994_v3  ;;  %v999_v8 = vld [vmem:[#allocation4 + $0x18] sm:$0xff]   ;;  %v1001_v10 = vld [vmem:[#allocation4 + $0x20] sm:$0xff]   ;;  %v1002_v11 = vld [vmem:[#allocation4 + $0x68] sm:$0xff]   ;;  %s799_s30 = sshll.u32 %s1492_s22, 2 }
  0x82   : > { %v287_v12 = vld [vmem:[%s243_s6 + $0x8] sm:$0xff]  ;;  %v1008_v14 = vld [vmem:[#allocation6] sm:$0xff]   ;;  %v1004_v16 = vld [vmem:[#allocation4 + $0x70] sm:$0xff]   ;;  %s284_s9 = scalar_lea.vmem %s1472_s5, %s799_s30 }
  0x83   : > { %v289_v13 = vpack.c.bf16 %v287_v12, %v287_v12  ;;  %v1003_v15 = vld [vmem:[#allocation4 + $0x28] sm:$0xff]   ;;  %879 = vmatpush3.bf16.msra.mxu1 %v1008_v14  ;;  %v1005_v18 = vld [vmem:[#allocation4 + $0x30] sm:$0xff]   ;;  %v1006_v19 = vld [vmem:[#allocation4 + $0x78] sm:$0xff]  }
  0x84   : > { %841 = vmatpush3.bf16.msra.mxu0 %v995_v4  ;;  %v1009_v17 = vld [vmem:[#allocation6 + $0x8] sm:$0xff]   ;;  %880 = vmatprep.subr.bf16.mxu1 %v1188_v0  ;;  %v1010_v20 = vld [vmem:[#allocation6 + $0x10] sm:$0xff]   ;;  %v1007_v21 = vld [vmem:[#allocation4 + $0x38] sm:$0xff]  }
  0x85   : > { %842 = vmatprep.subr.bf16.mxu0 %v996_v5  ;;  %455 = vmatprep.mubr.bf16.mxu0 %v289_v13  ;;  %v286_v22 = vld [vmem:[%s243_s6] sm:$0xff]  ;;  %v1011_v23 = vld [vmem:[#allocation6 + $0x18] sm:$0xff]   ;;  %v1013_v26 = vld [vmem:[#allocation6 + $0x28] sm:$0xff]  }
  0x86   : > { %v288_v24 = vpack.c.bf16 %v286_v22, %v286_v22  ;;  %v1012_v25 = vld [vmem:[#allocation6 + $0x20] sm:$0xff]   ;;  %v1014_v27 = vld [vmem:[#allocation6 + $0x30] sm:$0xff]   ;;  %v1015_v28 = vld [vmem:[#allocation6 + $0x38] sm:$0xff]  }
  0x87   : > { %881 = vmatpush3.bf16.msra.mxu1 %v1009_v17  ;;  %v1016_v29 = vld [vmem:[#allocation7] sm:$0xff]   ;;  %v1017_v30 = vld [vmem:[#allocation7 + $0x8] sm:$0xff]   ;;  %v1018_v31 = vld [vmem:[#allocation7 + $0x10] sm:$0xff]  }
  0x88   : > { %843 = vmatpush3.bf16.msra.mxu0 %v997_v6  ;;  %882 = vmatprep.subr.bf16.mxu1 %v1188_v0  ;;  %v1019_v32 = vld [vmem:[#allocation7 + $0x18] sm:$0xff]   ;;  %v1020_v33 = vld [vmem:[#allocation7 + $0x20] sm:$0xff]   ;;  %v1021_v34 = vld [vmem:[#allocation7 + $0x28] sm:$0xff]  }
  0x89   : > { %844 = vmatprep.subr.bf16.mxu0 %v998_v7  ;;  %v800_v36 = vld [vmem:[%s1471_s4] ss:$0 sm:$0xff]  ;;  %v1022_v45 = vld [vmem:[#allocation7 + $0x30] sm:$0xff]   ;;  %v1023_v46 = vld [vmem:[#allocation7 + $0x38] sm:$0xff]  }
  0x8a   : > { %v817_v47 = vld [vmem:[%s1471_s4 + $0x1] ss:$0 sm:$0xff]  ;;  %v826_v56 = vld [vmem:[%s1471_s4 + $0x2] ss:$0 sm:$0xff] }
  0x8b   : > { %883 = vmatpush3.bf16.msra.mxu1 %v1010_v20 }
  0x8c   : > { %845 = vmatpush3.bf16.msra.mxu0 %v999_v8  ;;  %884 = vmatprep.subr.bf16.mxu1 %v1188_v0 }
  0x8d   : > { %846 = vmatprep.subr.bf16.mxu0 %v1000_v9 }
  0x8f   : > { %885 = vmatpush3.bf16.msra.mxu1 %v1011_v23 }
  0x90   : > { %847 = vmatpush3.bf16.msra.mxu0 %v1001_v10  ;;  %886 = vmatprep.subr.bf16.mxu1 %v1188_v0 }
  0x91   : > { %848 = vmatprep.subr.bf16.mxu0 %v1002_v11 }
  0x93   : > { %887 = vmatpush3.bf16.msra.mxu1 %v1012_v25 }
  0x94   : > { %849 = vmatpush3.bf16.msra.mxu0 %v1003_v15  ;;  %888 = vmatprep.subr.bf16.mxu1 %v1188_v0 }
  0x95   : > { %850 = vmatprep.subr.bf16.mxu0 %v1004_v16 }
  0x97   : > { %889 = vmatpush3.bf16.msra.mxu1 %v1013_v26 }
  0x98   : > { %851 = vmatpush3.bf16.msra.mxu0 %v1005_v18  ;;  %890 = vmatprep.subr.bf16.mxu1 %v1188_v0 }
  0x99   : > { %852 = vmatprep.subr.bf16.mxu0 %v1006_v19 }
  0x9b   : > { %891 = vmatpush3.bf16.msra.mxu1 %v1014_v27 }
  0x9c   : > { %853 = vmatpush3.bf16.msra.mxu0 %v1007_v21  ;;  %892 = vmatprep.subr.bf16.mxu1 %v1188_v0 }
  0x9d   : > { %898 = vmatprep.subr.bf16.mxu0 %v1188_v0 }
  0x9f   : > { %456 = vmatmul.mubr.bf16.vlgmr.msra.gmra.mrb[0].mxu0 %v288_v24  ;;  %893 = vmatpush3.bf16.msra.mxu1 %v1015_v28 }
  0xa0   : > { %914 = vmatprep.mubr.msk.bf16.mxu0 %vm1189_vm0, %v1188_v0  ;;  %899 = vmatpush3.bf16.msra.mxu0 %v1016_v29 }
  0xa1   : > { %900 = vmatprep.subr.bf16.mxu0 %v1188_v0 }
  0xa4   : > { %901 = vmatpush3.bf16.msra.mxu0 %v1017_v30 }
  0xa5   : > { %902 = vmatprep.subr.bf16.mxu0 %v1188_v0 }
  0xa8   : > { %903 = vmatpush3.bf16.msra.mxu0 %v1018_v31 }
  0xa9   : > { %904 = vmatprep.subr.bf16.mxu0 %v1188_v0 }
  0xac   : > { %905 = vmatpush3.bf16.msra.mxu0 %v1019_v32 }
  0xad   : > { %906 = vmatprep.subr.bf16.mxu0 %v1188_v0 }
  0xb0   : > { %907 = vmatpush3.bf16.msra.mxu0 %v1020_v33 }
  0xb1   : > { %908 = vmatprep.subr.bf16.mxu0 %v1188_v0 }
  0xb4   : > { %909 = vmatpush3.bf16.msra.mxu0 %v1021_v34 }
  0xb5   : > { %910 = vmatprep.subr.bf16.mxu0 %v1188_v0 }
  0xb8   : > { %911 = vmatpush3.bf16.msra.mxu0 %v1022_v45 }
  0xb9   : > { %912 = vmatprep.subr.bf16.mxu0 %v1188_v0 }
  0xbc   : > { %913 = vmatpush3.bf16.msra.mxu0 %v1023_v46 }
 0x172   : > { %v854_v35 = vpop.f32.mrb[0].mxu0 }
 0x173   : > { %v855_v37 = vpop.f32.mrb[1].mxu0 }
 0x174   : > { %v856_v38 = vadd.f32 %v855_v37, %v854_v35  ;;  %v857_v39 = vpop.f32.mrb[2].mxu0 }
 0x175   : > { %v858_v40 = vpop.f32.mrb[3].mxu0 }
 0x176   : > { %v458_v41 = vadd.f32 %v856_v38, %v800_v36 }
 0x178   : > { %v464_v42 = vmul.f32 0.01, %v458_v41  ;;  %vm463_vm1 = vcmp.gt.f32.partialorder %v458_v41, 0.0 }
 0x17a   : > { %v465_v43 = vsel %vm463_vm1, %v458_v41, %v464_v42 }
 0x17b   : > { %v466_v44 = vpack.c.bf16 %v465_v43, %v465_v43 }
 0x17d   : > { %895 = vmatmul.mubr.bf16.vlgmr.msra.gmra.mrb[0].mxu1 %v466_v44 }
 0x250   : > { %v570_v48 = vpop.f32.mrb[0].mxu1 }
 0x251   : > { %v571_v49 = vadd.f32 %v817_v47, %v570_v48  ;;  %v896_v50 = vpop.f32.mrb[1].mxu1 }
 0x252   : > { %v573_v51 = vpop.f32.mrb[2].mxu1 }
 0x253   : > { %vm576_vm2 = vcmp.gt.f32.partialorder %v571_v49, 0.0  ;;  %v577_v52 = vmul.f32 0.01, %v571_v49  ;;  %v897_v53 = vpop.f32.mrb[3].mxu1 }
 0x255   : > { %v578_v54 = vsel %vm576_vm2, %v571_v49, %v577_v52 }
 0x256   : > { %v579_v55 = vpack.c.bf16 %v578_v54, %v578_v54 }
 0x258   : > { %915 = vmatmul.mubr.bf16.vlgmr.msra.gmra.mrb[4].mxu0 %v579_v55 }
 0x32b   : > { %v683_v57 = vpop.f32.mrb[4].mxu0 }
 0x32c   : > { %v684_v58 = vadd.f32 %v826_v56, %v683_v57  ;;  %v916_v59 = vpop.f32.mrb[5].mxu0 }
 0x32d   : > { %v686_v60 = vpop.f32.mrb[6].mxu0 }
 0x32e   : > { %v689_v61 = vpack.c.bf16 %v684_v58, %v684_v58  ;;  %v917_v62 = vpop.f32.mrb[7].mxu0 }
 0x330   : > { %690 = vst [vmem:[%s284_s9] sm:$0xf] %v689_v61 }
 0x331 PF: > { %p17_p9 = scmp.ge.s32.totalorder %s1350_s12, 4   ;;  %s1487_s18 = smov %s1172_s19 }
 0x332   : > { %s1488_s19 = smov %s1176_s20  ;;  %s1489_s20 = smov %s1360_s26 }
 0x333   : > { %s1490_s21 = smov %s1350_s12  ;;  %19 = sbr.rel (!%p17_p9) target bundleno = 5 (0x5), region = 92 }
 0x33a   :  { %710 = vsyncpa [#allocation3], 1 }
 0x33b   :  { %712 = vsyncpa [#allocation3 + $0x1], 1 }
 0x33c   :  { %713 = vsyncpa [#allocation5], 1 }
 0x33d   :  { %714 = vsyncpa [#allocation8], 1 }

</bundles_post_ra>
